<compile_context>
chip_gen: v5e
topology: v5e:2x2
jax: 0.10.0
libtpu: 0.0.40
codegen_flags: <defaults>
</compile_context>

<pallas_src>
import jax
import jax.numpy as jnp
from jax import lax
from jax.experimental import pallas as pl
from jax.experimental.pallas import tpu as pltpu


def _aggregator_kernel(curr_ref, alpha_ref, msg_ref, h_ref):
    # curr_ref : (tn, D)      mailbox['curr_emb'] slot 0
    # alpha_ref: (tn, M)      attention weights (trailing singleton squeezed)
    # msg_ref  : (tn, M*D)    neighbor messages, flattened for lane-aligned loads
    # h_ref    : (tn, D)      output embedding
    M = alpha_ref.shape[1]
    D = h_ref.shape[1]

    alpha = alpha_ref[...].astype(jnp.float32)                     # (tn, M)

    # update_embedding := curr_emb + nei_msg (residual update): start the f32
    # accumulator at curr_emb and fold in one mailbox slot at a time so no
    # (tn, M, D) f32 temporary is ever materialized (pure VPU work; per-node
    # 1xM . MxD is far below MXU tile size).
    acc = curr_ref[...].astype(jnp.float32)                        # (tn, D)

    if M <= 16:
        # Full unroll: ideal for small mailboxes (LLO sees the whole stream).
        for m in range(M):
            acc = acc + alpha[:, m:m + 1] * msg_ref[:, m * D:(m + 1) * D].astype(jnp.float32)
    else:
        # Bounded unroll for big mailboxes.
        def body(m, acc):
            start = m * D
            if D % 128 == 0:
                start = pl.multiple_of(start, 128)
            msg_m = msg_ref[:, pl.ds(start, D)].astype(jnp.float32)
            a_m = lax.dynamic_slice_in_dim(alpha, m, 1, axis=1)
            return acc + a_m * msg_m
        acc = lax.fori_loop(0, M, body, acc, unroll=4)

    h_ref[...] = acc.astype(h_ref.dtype)


def _round_up(x, m):
    return ((x + m - 1) // m) * m


def _vmem_budgets():
    """Generation-aware VMEM sizing (v5e/v6e: 128 MiB, v7x: 64 MiB per TC)."""
    cap = None
    try:
        cap = getattr(pltpu.get_tpu_info(), "vmem_capacity_bytes", None)
    except Exception:
        cap = None
    if not cap:
        cap = 64 * 1024 * 1024            # v7x-safe fallback
    tile_budget = cap // 2                # 32 MiB on v7x, 64 MiB on v5e/v6e
    vmem_limit = (3 * cap) // 4           # 48 MiB on v7x, 96 MiB on v5e/v6e
    return int(tile_budget), int(vmem_limit)


def _choose_node_tile(N, M, D, dtype, tile_budget_bytes):
    itemsize = jnp.dtype(dtype).itemsize
    packing = 8 * max(1, 4 // itemsize)   # sublane packing: 8 f32, 16 bf16, 32 int8
    # Double-buffered operand bytes per row (msg + alpha + curr + h), plus the
    # kernel's f32 temporaries (accumulator + per-slot casts).
    per_row = 2 * itemsize * (M * D + M + 2 * D) + 4 * (2 * D + M)
    tile = max(packing, tile_budget_bytes // max(per_row, 1))
    tile = min(tile, 1024)                # diminishing returns past ~1K rows
    # Keep the grid at several steps (pipelining + v7x megacore), but never
    # shrink tiles below ~256 rows when N is large.
    min_steps, floor_rows = 8, 256
    target = max(_round_up(pl.cdiv(N, min_steps), packing),
                 min(floor_rows, _round_up(pl.cdiv(N, 2), packing)))
    tile = min(tile, target)
    return max(packing, (tile // packing) * packing)


def aggregator_forward(curr_emb_mailbox, alpha, msg):
    """Pallas implementation of Aggregator.forward.

    Args:
      curr_emb_mailbox: (N, M, D) float array, node.mailbox['curr_emb'].
      alpha:            (N, M, 1) float array, node.mailbox['alpha'].
      msg:              (N, M, D) float array, node.mailbox['msg'].

    Returns:
      {'h': (N, D) array}
    """
    N, M, D = msg.shape
    assert curr_emb_mailbox.shape == (N, M, D)
    assert alpha.shape == (N, M, 1)

    dtype = msg.dtype
    itemsize = jnp.dtype(dtype).itemsize
    tile_budget, vmem_limit = _vmem_budgets()
    node_tile = _choose_node_tile(N, M, D, dtype, tile_budget)
    grid = (pl.cdiv(N, node_tile),)       # no padding: Pallas masks the boundary block

    # Layout plumbing only (free bitcast reshapes of contiguous arrays):
    msg2 = msg.reshape(N, M * D)          # lane-aligned per-slot chunks
    alpha2 = alpha.reshape(N, M)          # drop trailing singleton

    if D % 128 == 0 or M == 1:
        # DMA mailbox slot 0 straight out of the (N, M*D) HBM layout; no
        # XLA-side slice materialization (extra ~2*N*D HBM traffic avoided).
        curr_in = curr_emb_mailbox.reshape(N, M * D)
    else:
        # Lane dim not 128-aligned: fall back to a materialized slot-0 slice.
        curr_in = curr_emb_mailbox[:, 0, :]
    curr_spec = pl.BlockSpec((node_tile, D), lambda i: (i, 0))

    bytes_accessed = itemsize * (N * M * D + N * M + 2 * N * D)
    flops = 2 * N * M * D + N * D

    h = pl.pallas_call(
        _aggregator_kernel,
        out_shape=jax.ShapeDtypeStruct((N, D), dtype),
        grid_spec=pltpu.PrefetchScalarGridSpec(
            num_scalar_prefetch=0,
            grid=grid,
            in_specs=[
                curr_spec,                                           # curr_emb (slot 0 only)
                pl.BlockSpec((node_tile, M), lambda i: (i, 0)),      # alpha (squeezed)
                pl.BlockSpec((node_tile, M * D), lambda i: (i, 0)),  # msg (flattened)
            ],
            out_specs=pl.BlockSpec((node_tile, D), lambda i: (i, 0)),
        ),
        compiler_params=pltpu.CompilerParams(
            dimension_semantics=("parallel",),
            vmem_limit_bytes=vmem_limit,
        ),
        cost_estimate=pl.CostEstimate(
            flops=flops, transcendentals=0, bytes_accessed=bytes_accessed),
    )(curr_in, alpha2, msg2)

    return {"h": h}


def _reference_forward(curr_emb_mailbox, alpha, msg):
    """Pure-JAX reference mirroring the torch code."""
    curr_emb = curr_emb_mailbox[:, 0, :]                               # (N, D)
    nei_msg = jnp.squeeze(
        jnp.einsum("nim,nmd->nid", jnp.transpose(alpha, (0, 2, 1)), msg), axis=1
    )                                                                  # (N, D)
    return {"h": curr_emb + nei_msg}


if __name__ == "__main__":
    key = jax.random.PRNGKey(0)
    # N deliberately not a tile multiple so the masked boundary block runs;
    # D = 128 keeps the last dim lane-dense and exercises the direct slot-0 DMA.
    N, M, D = 100, 8, 128  # nodes, mailbox size, emb_dim

    k1, k2, k3 = jax.random.split(key, 3)
    curr_emb_mailbox = jax.random.normal(k1, (N, M, D), dtype=jnp.float32)
    alpha = jax.nn.softmax(jax.random.normal(k2, (N, M, 1), dtype=jnp.float32), axis=1)
    msg = jax.random.normal(k3, (N, M, D), dtype=jnp.float32)

    out = aggregator_forward(curr_emb_mailbox, alpha, msg)
    h = jax.block_until_ready(out["h"])

    ref = _reference_forward(curr_emb_mailbox, alpha, msg)["h"]
    assert h.shape == (N, D)
    assert jnp.allclose(h, ref, atol=1e-5, rtol=1e-5), "mismatch vs reference"

    print("KERNEL_OK")
</pallas_src>

<mosaic_0001>
module attributes {stable_mosaic.version = 11 : i64} {
  func.func @_aggregator_kernel(%arg0: i32, %arg1: memref<56x128xf32, #tpu.memory_space<vmem>>, %arg2: memref<56x8xf32, #tpu.memory_space<vmem>>, %arg3: memref<56x1024xf32, #tpu.memory_space<vmem>>, %arg4: memref<56x128xf32, #tpu.memory_space<vmem>>) attributes {dimension_semantics = [#tpu.dimension_semantics<parallel>], iteration_bounds = array<i64: 2>, scalar_prefetch = 0 : i64, scratch_operands = 0 : i64, tpu.core_type = #tpu.core_type<tc>, window_params = [{transform_indices = @transform_0, window_bounds = array<i64: 56, 128>}, {transform_indices = @transform_1, window_bounds = array<i64: 56, 8>}, {transform_indices = @transform_2, window_bounds = array<i64: 56, 1024>}, {transform_indices = @transform_3, window_bounds = array<i64: 56, 128>}]} {
    %c0 = arith.constant 0 : index
    %c0_0 = arith.constant 0 : index
    %0 = vector.load %arg2[%c0, %c0_0] : memref<56x8xf32, #tpu.memory_space<vmem>>, vector<56x8xf32>
    %c0_1 = arith.constant 0 : index
    %c0_2 = arith.constant 0 : index
    %1 = vector.load %arg1[%c0_1, %c0_2] : memref<56x128xf32, #tpu.memory_space<vmem>>, vector<56x128xf32>
    %2 = vector.extract_strided_slice %0 {offsets = [0, 0], sizes = [56, 1], strides = [1, 1]} : vector<56x8xf32> to vector<56x1xf32>
    %c0_3 = arith.constant 0 : index
    %c0_4 = arith.constant 0 : index
    %3 = vector.load %arg3[%c0_3, %c0_4] : memref<56x1024xf32, #tpu.memory_space<vmem>>, vector<56x128xf32>
    %4 = vector.broadcast %2 : vector<56x1xf32> to vector<56x128xf32>
    %5 = arith.mulf %4, %3 : vector<56x128xf32>
    %6 = arith.addf %1, %5 : vector<56x128xf32>
    %7 = vector.extract_strided_slice %0 {offsets = [0, 1], sizes = [56, 1], strides = [1, 1]} : vector<56x8xf32> to vector<56x1xf32>
    %c0_5 = arith.constant 0 : index
    %c128 = arith.constant 128 : index
    %8 = vector.load %arg3[%c0_5, %c128] : memref<56x1024xf32, #tpu.memory_space<vmem>>, vector<56x128xf32>
    %9 = vector.broadcast %7 : vector<56x1xf32> to vector<56x128xf32>
    %10 = arith.mulf %9, %8 : vector<56x128xf32>
    %11 = arith.addf %6, %10 : vector<56x128xf32>
    %12 = vector.extract_strided_slice %0 {offsets = [0, 2], sizes = [56, 1], strides = [1, 1]} : vector<56x8xf32> to vector<56x1xf32>
    %c0_6 = arith.constant 0 : index
    %c256 = arith.constant 256 : index
    %13 = vector.load %arg3[%c0_6, %c256] : memref<56x1024xf32, #tpu.memory_space<vmem>>, vector<56x128xf32>
    %14 = vector.broadcast %12 : vector<56x1xf32> to vector<56x128xf32>
    %15 = arith.mulf %14, %13 : vector<56x128xf32>
    %16 = arith.addf %11, %15 : vector<56x128xf32>
    %17 = vector.extract_strided_slice %0 {offsets = [0, 3], sizes = [56, 1], strides = [1, 1]} : vector<56x8xf32> to vector<56x1xf32>
    %c0_7 = arith.constant 0 : index
    %c384 = arith.constant 384 : index
    %18 = vector.load %arg3[%c0_7, %c384] : memref<56x1024xf32, #tpu.memory_space<vmem>>, vector<56x128xf32>
    %19 = vector.broadcast %17 : vector<56x1xf32> to vector<56x128xf32>
    %20 = arith.mulf %19, %18 : vector<56x128xf32>
    %21 = arith.addf %16, %20 : vector<56x128xf32>
    %22 = vector.extract_strided_slice %0 {offsets = [0, 4], sizes = [56, 1], strides = [1, 1]} : vector<56x8xf32> to vector<56x1xf32>
    %c0_8 = arith.constant 0 : index
    %c512 = arith.constant 512 : index
    %23 = vector.load %arg3[%c0_8, %c512] : memref<56x1024xf32, #tpu.memory_space<vmem>>, vector<56x128xf32>
    %24 = vector.broadcast %22 : vector<56x1xf32> to vector<56x128xf32>
    %25 = arith.mulf %24, %23 : vector<56x128xf32>
    %26 = arith.addf %21, %25 : vector<56x128xf32>
    %27 = vector.extract_strided_slice %0 {offsets = [0, 5], sizes = [56, 1], strides = [1, 1]} : vector<56x8xf32> to vector<56x1xf32>
    %c0_9 = arith.constant 0 : index
    %c640 = arith.constant 640 : index
    %28 = vector.load %arg3[%c0_9, %c640] : memref<56x1024xf32, #tpu.memory_space<vmem>>, vector<56x128xf32>
    %29 = vector.broadcast %27 : vector<56x1xf32> to vector<56x128xf32>
    %30 = arith.mulf %29, %28 : vector<56x128xf32>
    %31 = arith.addf %26, %30 : vector<56x128xf32>
    %32 = vector.extract_strided_slice %0 {offsets = [0, 6], sizes = [56, 1], strides = [1, 1]} : vector<56x8xf32> to vector<56x1xf32>
    %c0_10 = arith.constant 0 : index
    %c768 = arith.constant 768 : index
    %33 = vector.load %arg3[%c0_10, %c768] : memref<56x1024xf32, #tpu.memory_space<vmem>>, vector<56x128xf32>
    %34 = vector.broadcast %32 : vector<56x1xf32> to vector<56x128xf32>
    %35 = arith.mulf %34, %33 : vector<56x128xf32>
    %36 = arith.addf %31, %35 : vector<56x128xf32>
    %37 = vector.extract_strided_slice %0 {offsets = [0, 7], sizes = [56, 1], strides = [1, 1]} : vector<56x8xf32> to vector<56x1xf32>
    %c0_11 = arith.constant 0 : index
    %c896 = arith.constant 896 : index
    %38 = vector.load %arg3[%c0_11, %c896] : memref<56x1024xf32, #tpu.memory_space<vmem>>, vector<56x128xf32>
    %39 = vector.broadcast %37 : vector<56x1xf32> to vector<56x128xf32>
    %40 = arith.mulf %39, %38 : vector<56x128xf32>
    %41 = arith.addf %36, %40 : vector<56x128xf32>
    %c0_12 = arith.constant 0 : index
    %c0_13 = arith.constant 0 : index
    %42 = vector.load %arg4[%c0_12, %c0_13] : memref<56x128xf32, #tpu.memory_space<vmem>>, vector<56x128xf32>
    tpu.vector_store %arg4[%c0_12, %c0_13], %41 {strides = array<i32>} : memref<56x128xf32, #tpu.memory_space<vmem>>, vector<56x128xf32>,
    return
  }
  func.func @transform_0(%arg0: i32) -> (i32, i32) {
    %c0_i32 = arith.constant 0 : i32
    %c0_i32_0 = arith.constant 0 : i32
    return %arg0, %c0_i32 : i32, i32
  }
  func.func @transform_1(%arg0: i32) -> (i32, i32) {
    %c0_i32 = arith.constant 0 : i32
    %c0_i32_0 = arith.constant 0 : i32
    return %arg0, %c0_i32 : i32, i32
  }
  func.func @transform_2(%arg0: i32) -> (i32, i32) {
    %c0_i32 = arith.constant 0 : i32
    %c0_i32_0 = arith.constant 0 : i32
    return %arg0, %c0_i32 : i32, i32
  }
  func.func @transform_3(%arg0: i32) -> (i32, i32) {
    %c0_i32 = arith.constant 0 : i32
    %c0_i32_0 = arith.constant 0 : i32
    return %arg0, %c0_i32 : i32, i32
  }
}

</mosaic_0001>

<bundles_post_ra>
// kernel: tpu_custom_call.1
= control target key start
LH: loop header
LB: loop body
LE: loop exit
PB: predicated region body
PF: predicated region fallthrough
CT: control target
= control target key end

     0   :  { %8 = vsyncpa [#allocation3], 0  ;;  %s1622_s0 = inlined_call_operand.hbm [shape: f32[100,1024], index: 0, kind: input, shape index: {}]   ;;  %s1623_s1 = inlined_call_operand.vmem [shape: f32[100,8], index: 1, kind: input, shape index: {}]   ;;  %s1624_s2 = inlined_call_operand.hbm [shape: f32[100,1024], index: 2, kind: input, shape index: {}]   ;;  %s1625_s3 = inlined_call_operand.hbm [shape: f32[100,128], index: 3, kind: output, shape index: {}]  }
   0x1   :  { %10 = vsyncpa [#allocation3 + $0x1], 0 }
   0x2   :  { %11 = vsyncpa [#allocation6], 0 }
   0x3   :  { %13 = vsyncpa [#allocation6 + $0x1], 0 }
   0x4   :  { %14 = vsyncpa [#allocation4], 0 }
   0x5   :  { %16 = vsyncpa [#allocation4 + $0x1], 0  ;;  %s1174_s12 = smov 0   ;;  %s1176_s13 = smov 0  }
   0x6   :  { %s1178_s14 = smov 0   ;;  %s1180_s15 = smov 0  }
   0x7 LB: > { %s1195_s16 = sadd.s32 4294967295, %s1134_s15   ;;  %s859_s17 = sadd.s32 4294967294, %s1134_s15   ;;  %s1134_s15 = sphi %s1180_s15, %s1639_s15   ;;  %s1130_s14 = sphi %s1178_s14, %s1638_s14   ;;  %s1126_s13 = sphi %s1176_s13, %s1637_s13   ;;  %s1122_s12 = sphi %s1174_s12, %s1636_s12  }
   0x8   : > { %s1199_s18 = sadd.s32 1, %s1134_s15   ;;  %s29_s19 = sadd.s32 1, %s1130_s14 }
   0x9   : > { %s26_s20 = ssub.s32 %s1134_s15, %s1199_s18  ;;  %p36_p0 = scmp.ne.s32.totalorder %s1130_s14, %s1126_s13 }
   0xa   : > { %p27_p1 = scmp.eq.s32.totalorder %s26_s20, 0  ;;  %p37_p2 = scmp.eq.s32.totalorder %s1134_s15, 0 }
   0xb   : > { %p42_p3 = scmp.ne.s32.totalorder %s1126_s13, %s1122_s12  ;;  %p43_p4 = scmp.eq.s32.totalorder %s1195_s16, 0 }
   0xc   : > { %s1211_s21 = scalar_select %p27_p1, %s1130_s14, %s29_s19  }
   0xd   : > { %p1213_p5 = por %p37_p2, %p36_p0  ;;  %p1217_p6 = por %p43_p4, %p42_p3 }
   0xe   : > { %p118_p7 = scmp.eq.s32.totalorder %s1195_s16, 1  ;;  %p124_p8 = scmp.eq.s32.totalorder %s859_s17, 1 }
   0xf   : > { %p1626_p11 = scmp.ge.s32.totalorder %s1134_s15, 2 }
  0x10   : > { %p1222_p9 = por %p118_p7, %p36_p0  ;;  %p1226_p10 = por %p124_p8, %p42_p3 }
  0x11   : > { %140 = sbr.rel (%p1626_p11) target bundleno = 99 (0x63), region = 16 }
  0x12   : > { %s1630_s25 = scalar_select %p1226_p10, 1, 0 }
  0x16   : > { %143 = sbr.rel (!%p1213_p5) target bundleno = 61 (0x3d), region = 20  ;;  %s144_s26 = sand.u32 (%p1213_p5), 1, %s1130_s14  }
  0x17   : > { %s149_s27 = smul.u32 (%p1213_p5), 7, %s1134_s15  ;;  %s1240_s6 = scalar_lea.sflag (%p1213_p5), [#allocation3], %s144_s26 }
  0x18   : > { %s892_s28 = smul.u32 (%p1213_p5), 56, %s144_s26 }
  0x19   : > { %s150_s29 = ssub.s32 (%p1213_p5), 13, %s149_s27 }
  0x1a   : > { %p151_p12 = scmp.lt.s32.totalorder (%p1213_p5), %s150_s29, 7  ;;  %s148_s7 = scalar_lea.vmem (%p1213_p5), [#allocation2], %s892_s28 }
  0x1c   : > { %s1641_s29 = smov (!%p151_p12, %s150_s29), 7 }
  0x1d   : > { %s862_s30 = sshll.u32 %s1641_s29, 3 }
  0x1e   : > { %s154_s4 = ssub.s32 56, %s862_s30 }
  0x1f   : > { %s155_s5 = sshll.u32 %s154_s4, 4 }
  0x20   : > { %156 = vsyncadd %s1240_s6, %s155_s5  ;;  %p1243_p13 = scmp.ne.s32.totalorder %s862_s30, 0  ;;  %s890_s9 = smul.u32 448, %s1134_s15 }
  0x21   : > { %s1248_s10 = sshll.u32 %s148_s7, 4  ;;  %s867_s11 = sshll.u32 %s1641_s29, 7  ;;  %s165_s10 = int_to_ptr.vmem [resolvable:$true] %s1248_s10 }
  0x22   : > { %s160_s20 = scalar_lea.hbm %s1622_s0, %s890_s9  ;;  %s977_s28 = sshrl.u32 %s867_s11, 4 }
  0x23   : > { %s162_s26 = sshll.u32 %s160_s20, 4  ;;  %s986_s7 = scalar_lea.hbm %s1622_s0, 832  ;;  %s1255_s26 = int_to_ptr.hbm [resolvable:$true] %s162_s26 }
  0x24   : > { %s975_s27 = sshra.s32 %s1255_s26, 4  ;;  %s976_s27 = int_to_ptr.hbm [resolvable:$true] %s975_s27 }
  0x25   : > { %s982_s30 = scalar_lea.hbm %s976_s27, %s977_s28  ;;  %p987_p3 = scmp.lt.s32.totalorder %s976_s27, %s1622_s0 }
  0x26   : > { %p983_p0 = scmp.ne.s32.totalorder %s976_s27, %s982_s30  ;;  %p988_p4 = scmp.lt.s32.totalorder %s986_s7, %s982_s30 }
  0x28   : > { %p984_p1 = pnand %p983_p0, %p1243_p13  ;;  %p989_p7 = por %p988_p4, %p987_p3 }
  0x2a   : > { %p985_p2 = pneg %p984_p1 }
  0x2c   : > { %p990_p8 = pnand %p989_p7, %p985_p2 }
  0x2e   : > { %993 = shalt.err (!%p990_p8)
}
  0x2f   : > { %s994_s19 = sshra.s32 %s165_s10, 4  ;;  %s1136_s4 = smov [#allocation2]   ;;  %s995_s19 = int_to_ptr.vmem [resolvable:$true] %s994_s19 }
  0x30   : > { %s1001_s20 = scalar_lea.vmem %s995_s19, %s977_s28  ;;  %s1005_s5 = scalar_lea.vmem %s1136_s4, 112 }
  0x31   : > { %p1002_p12 = scmp.ne.s32.totalorder %s995_s19, %s1001_s20  ;;  %p1007_p11 = scmp.lt.s32.totalorder %s1005_s5, %s1001_s20 }
  0x33   : > { %p1003_p0 = pnand %p1002_p12, %p1243_p13 }
  0x35   : > { %p1004_p1 = pneg %p1003_p0 }
  0x37   : > { %p1009_p10 = pnand %p1007_p11, %p1004_p1 }
  0x39   : > { %1012 = shalt.err (!%p1009_p10)
}
  0x3a   : > { %s1137_s27 = smov 1024   ;;  %s1138_s30 = smov 128  }
  0x3b   : > { %s1139_s7 = smov 8  }
  0x3c   : > { %170 = dma.hbm_to_vmem [thread:$0]  (%p1243_p13), %s1255_s26, %s867_s11, %s165_s10, %s1240_s6, %s1137_s27, %s1138_s30, %s1139_s7  }
  0x3d PF: > { %190 = sbr.rel (!%p1213_p5) target bundleno = 99 (0x63), region = 28  ;;  %s191_s28 = sand.u32 (%p1213_p5), 1, %s1130_s14  }
  0x3e   : > { %s196_s17 = smul.u32 (%p1213_p5), 7, %s1134_s15  ;;  %s1287_s5 = scalar_lea.sflag (%p1213_p5), [#allocation6], %s191_s28 }
  0x3f   : > { %s893_s9 = smul.u32 (%p1213_p5), 448, %s191_s28 }
  0x40   : > { %s197_s19 = ssub.s32 (%p1213_p5), 13, %s196_s17 }
  0x41   : > { %p198_p10 = scmp.lt.s32.totalorder (%p1213_p5), %s197_s19, 7  ;;  %s195_s29 = scalar_lea.vmem (%p1213_p5), [#allocation5], %s893_s9 }
  0x43   : > { %s1643_s19 = smov (!%p198_p10, %s197_s19), 7 }
  0x44   : > { %s886_s20 = sshll.u32 %s1643_s19, 6 }
  0x45   : > { %s202_s4 = ssub.s32 448, %s886_s20 }
  0x46   : > { %s203_s8 = sshll.u32 %s202_s4, 4 }
  0x47   : > { %204 = vsyncadd %s1287_s5, %s203_s8  ;;  %p1290_p5 = scmp.ne.s32.totalorder %s886_s20, 0  ;;  %s891_s6 = smul.u32 448, %s1134_s15 }
  0x48   : > { %s1295_s10 = sshll.u32 %s195_s29, 4  ;;  %s874_s11 = sshll.u32 %s1643_s19, 10  ;;  %s213_s10 = int_to_ptr.vmem [resolvable:$true] %s1295_s10 }
  0x49   : > { %s208_s30 = scalar_lea.hbm %s1624_s2, %s891_s6  ;;  %s1016_s17 = sshrl.u32 %s874_s11, 4 }
  0x4a   : > { %s210_s7 = sshll.u32 %s208_s30, 4  ;;  %s1025_s8 = scalar_lea.hbm %s1624_s2, 832  ;;  %s1302_s7 = int_to_ptr.hbm [resolvable:$true] %s210_s7 }
  0x4b   : > { %s1014_s28 = sshra.s32 %s1302_s7, 4  ;;  %s1015_s28 = int_to_ptr.hbm [resolvable:$true] %s1014_s28 }
  0x4c   : > { %s1021_s9 = scalar_lea.hbm %s1015_s28, %s1016_s17  ;;  %p1026_p3 = scmp.lt.s32.totalorder %s1015_s28, %s1624_s2 }
  0x4d   : > { %p1022_p11 = scmp.ne.s32.totalorder %s1015_s28, %s1021_s9  ;;  %p1027_p4 = scmp.lt.s32.totalorder %s1025_s8, %s1021_s9 }
  0x4f   : > { %p1023_p13 = pnand %p1022_p11, %p1290_p5  ;;  %p1028_p7 = por %p1027_p4, %p1026_p3 }
  0x51   : > { %p1024_p2 = pneg %p1023_p13 }
  0x53   : > { %p1029_p8 = pnand %p1028_p7, %p1024_p2 }
  0x55   : > { %1032 = shalt.err (!%p1029_p8)
}
  0x56   : > { %s1033_s26 = sshra.s32 %s213_s10, 4  ;;  %s1140_s30 = smov [#allocation5]   ;;  %s1034_s26 = int_to_ptr.vmem [resolvable:$true] %s1033_s26 }
  0x57   : > { %s1040_s27 = scalar_lea.vmem %s1034_s26, %s1016_s17  ;;  %s1044_s20 = scalar_lea.vmem %s1140_s30, 896 }
  0x58   : > { %p1041_p12 = scmp.ne.s32.totalorder %s1034_s26, %s1040_s27  ;;  %p1046_p10 = scmp.lt.s32.totalorder %s1044_s20, %s1040_s27 }
  0x5a   : > { %p1042_p0 = pnand %p1041_p12, %p1290_p5 }
  0x5c   : > { %p1043_p1 = pneg %p1042_p0 }
  0x5e   : > { %p1048_p11 = pnand %p1046_p10, %p1043_p1 }
  0x60   : > { %1051 = shalt.err (!%p1048_p11)
}
  0x61   : > { %s1141_s28 = smov 1024   ;;  %s1142_s9 = smov 64  }
  0x62   : > { %218 = dma.hbm_to_vmem [thread:$0]  (%p1290_p5), %s1302_s7, %s874_s11, %s213_s10, %s1287_s5, %s1141_s28, %s1141_s28, %s1142_s9  }
  0x63 PF: > { %p875_p13 = scmp.ge.s32.totalorder %s1134_s15, 1  ;;  %p220_p2 = scmp.lt.s32.totalorder %s1134_s15, 3 }
  0x65   : > { %p221_p3 = pnand %p875_p13, %p220_p2 }
  0x66   : > { %s1330_s17 = sand.u32 (!%p221_p3), 1, %s1126_s13  }
  0x67   : > { %224 = sbr.rel (%p221_p3) target bundleno = 441 (0x1b9), region = 32  ;;  %s227_s22 = scalar_lea.sflag (!%p221_p3), [#allocation3], %s1330_s17 }
  0x68   : > { %s894_s4 = smul.u32 (!%p221_p3), 56, %s1330_s17 }
  0x6a   : > { %s1336_s19 = scalar_lea.vmem (!%p221_p3), [#allocation2], %s894_s4 }
  0x6c   : > { %1109 = dma.done.wait (%p1217_p6), %s227_s22, 896  }
  0x6d   : > { %1111 = vsyncadd (%p1217_p6), %s227_s22, 4294966400  ;;  %s895_s5 = smul.u32 448, %s1330_s17  ;;  %s237_s10 = scalar_lea.sflag [#allocation6], %s1330_s17 }
  0x6f   : > { %s1344_s11 = scalar_lea.vmem [#allocation5], %s895_s5 }
  0x70   : > { %1113 = dma.done.wait (%p1217_p6), %s237_s10, 7168  }
  0x71   : > { %1115 = vsyncadd (%p1217_p6), %s237_s10, 4294960128  ;;  %s1351_s7 = smul.u32 7, %s1195_s16  ;;  %v1143_v0 = vmov 0   ;;  %v1144_v8 = vmov 1   ;;  %v1145_v9 = vmov 2   ;;  %v1146_v10 = vmov 3  }
  0x72   : > { %953 = vset.pattern.permute.xlu2 %v1143_v0  ;;  %952 = vset.pattern.permute.xlu1 %v1143_v0  ;;  %v1147_v11 = vmov 4   ;;  %v1148_v12 = vmov 5   ;;  %v1149_v14 = vmov 6   ;;  %v326_v16 = vld [vmem:[%s1344_s11 + $0x100] sm:$0xff]  ;;  %v319_v19 = vld [vmem:[%s1336_s19 + $0x20] sm:$0xff]  ;;  %v1150_v20 = vmov 7  }
  0x73   : > { %951 = vset.pattern.permute.xlu0 %v1143_v0  ;;  %p288_p5 = scmp.lt.s32.totalorder %s1351_s7, 12  ;;  %v382_v21 = vld [vmem:[%s1344_s11 + $0x108] sm:$0xff]  ;;  %v323_v29 = vld [vmem:[%s1344_s11 + $0x40] sm:$0xff]  ;;  %v316_v31 = vld [vmem:[%s1336_s19 + $0x8] sm:$0xff]  ;;  %s1516_s23 = scalar_lea.vmem [#allocation7], %s894_s4 }
  0x74   : > { %v379_v28 = vld [vmem:[%s1344_s11 + $0x48] sm:$0xff]  ;;  %v322_v35 = vld [vmem:[%s1344_s11] sm:$0xff]  ;;  %v429_v61 = vld [vmem:[%s1344_s11 + $0x90] sm:$0xff]  ;;  %s729_s30 = scalar_lea.sflag [#allocation4], %s1330_s17  ;;  %s737_s20 = ssub.s32 (%p1222_p9), 13, %s1351_s7 }
  0x75   : > { %s289_s8 = scalar_select %p288_p5, %s1351_s7, 12  ;;  %v315_v39 = vld [vmem:[%s1336_s19] sm:$0xff]  ;;  %v328_v42 = vld [vmem:[%s1344_s11 + $0x180] sm:$0xff] }
  0x76   : > { %v384_v41 = vld [vmem:[%s1344_s11 + $0x188] sm:$0xff]  ;;  %v321_v45 = vld [vmem:[%s1336_s19 + $0x30] sm:$0xff]  ;;  %v431_v0 = vld [vmem:[%s1344_s11 + $0x110] sm:$0xff]  ;;  %p738_p6 = scmp.lt.s32.totalorder (%p1222_p9), %s737_s20, 7 }
  0x77   : > { %s876_s29 = sshll.u32 %s289_s8, 3  ;;  %v378_v43 = vld [vmem:[%s1344_s11 + $0x8] sm:$0xff]  ;;  %v324_v51 = vld [vmem:[%s1344_s11 + $0x80] sm:$0xff] }
  0x78   : > { %s291_s27 = scalar_lea.vmem %s1623_s1, %s876_s29  ;;  %v325_v53 = vld [vmem:[%s1344_s11 + $0xc0] sm:$0xff]  ;;  %v381_v62 = vld [vmem:[%s1344_s11 + $0xc8] sm:$0xff] }
  0x79   : > { %v1358_v1 = vld [vmem:[%s291_s27 + $0x20] sm:$0xff]  ;;  %v1360_v2 = vld [vmem:[%s291_s27 + $0x10] sm:$0xff]  ;;  %v1367_v4 = vld [vmem:[%s291_s27 + $0x28] sm:$0xff] }
  0x7a   : > { %v1362_v3 = vld [vmem:[%s291_s27] sm:$0xff]  ;;  %351 = vperm.xlu2 %953, %v1358_v1   ;;  %341 = vperm.xlu1 %952, %v1360_v2   ;;  %v1369_v5 = vld [vmem:[%s291_s27 + $0x18] sm:$0xff]  ;;  %v1371_v6 = vld [vmem:[%s291_s27 + $0x8] sm:$0xff] }
  0x7b   : > { %331 = vperm.xlu0 %951, %v1362_v3   ;;  %v1376_v7 = vld [vmem:[%s291_s27 + $0x30] sm:$0xff]  ;;  %v380_v63 = vld [vmem:[%s1344_s11 + $0x88] sm:$0xff] }
  0x7c   : > { %v317_v58 = vld [vmem:[%s1336_s19 + $0x10] sm:$0xff]  ;;  %v318_v59 = vld [vmem:[%s1336_s19 + $0x18] sm:$0xff] }
  0x82   : > { %356 = vperm.xlu2 %953, %v1367_v4   ;;  %346 = vperm.xlu1 %952, %v1369_v5  }
  0x83   : > { %336 = vperm.xlu0 %951, %v1371_v6  }
  0x8a   : > { %955 = vset.pattern.permute.xlu2 %v1144_v8  ;;  %954 = vset.pattern.permute.xlu1 %v1144_v8 }
  0x8b   : > { %361 = vperm.xlu0 %951, %v1376_v7   ;;  %390 = vperm.xlu2 %955, %v1371_v6  }
  0x8c   : > { %386 = vperm.xlu1 %954, %v1362_v3  }
  0x93   : > { %956 = vset.pattern.permute.xlu0 %v1144_v8  ;;  %402 = vperm.xlu2 %955, %v1358_v1  }
  0x94   : > { %398 = vperm.xlu1 %954, %v1369_v5   ;;  %394 = vperm.xlu0 %956, %v1360_v2  }
  0x9b   : > { %410 = vperm.xlu2 %955, %v1376_v7  }
  0x9c   : > { %406 = vperm.xlu1 %954, %v1367_v4   ;;  %957 = vset.pattern.permute.xlu0 %v1145_v9 }
  0x9d   : > { %435 = vperm.xlu0 %957, %v1362_v3  }
  0xa3   : > { %959 = vset.pattern.permute.xlu2 %v1145_v9 }
  0xa4   : > { %958 = vset.pattern.permute.xlu1 %v1145_v9  ;;  %443 = vperm.xlu2 %959, %v1360_v2  }
  0xa5   : > { %439 = vperm.xlu1 %958, %v1371_v6   ;;  %455 = vperm.xlu0 %957, %v1367_v4  }
  0xac   : > { %451 = vperm.xlu2 %959, %v1358_v1  }
  0xad   : > { %447 = vperm.xlu1 %958, %v1369_v5   ;;  %961 = vset.pattern.permute.xlu0 %v1146_v10 }
  0xae   : > { %488 = vperm.xlu0 %961, %v1371_v6  }
  0xb4   : > { %960 = vset.pattern.permute.xlu2 %v1146_v10 }
  0xb5   : > { %459 = vperm.xlu1 %958, %v1376_v7   ;;  %484 = vperm.xlu2 %960, %v1362_v3  }
  0xb6   : > { %508 = vperm.xlu0 %961, %v1376_v7  }
  0xbd   : > { %962 = vset.pattern.permute.xlu1 %v1146_v10  ;;  %496 = vperm.xlu2 %960, %v1369_v5  }
  0xbe   : > { %492 = vperm.xlu1 %962, %v1360_v2   ;;  %965 = vset.pattern.permute.xlu0 %v1147_v11 }
  0xbf   : > { %541 = vperm.xlu0 %965, %v1360_v2  }
  0xc5   : > { %504 = vperm.xlu2 %960, %v1367_v4  }
  0xc6   : > { %500 = vperm.xlu1 %962, %v1358_v1  }
  0xc7   : > { %966 = vset.pattern.permute.xlu0 %v1148_v12 }
  0xc8   : > { %582 = vperm.xlu0 %966, %v1362_v3  }
  0xcd   : > { %964 = vset.pattern.permute.xlu2 %v1147_v11 }
  0xce   : > { %963 = vset.pattern.permute.xlu1 %v1147_v11  ;;  %537 = vperm.xlu2 %964, %v1371_v6  }
  0xcf   : > { %533 = vperm.xlu1 %963, %v1362_v3  }
  0xd0   : > { %602 = vperm.xlu0 %966, %v1367_v4  }
  0xd4   : > { %v352_v13 = vpop.permute.xlu2 %351 }
  0xd5   : > { %v368_v18 = vmul.f32 %v352_v13, %v326_v16  ;;  %v327_v16 = vld [vmem:[%s1344_s11 + $0x140] sm:$0xff] }
  0xd6   : > { %549 = vperm.xlu2 %964, %v1358_v1  }
  0xd7   : > { %545 = vperm.xlu1 %963, %v1369_v5   ;;  %v375_v22 = vadd.f32 %v368_v18, %v319_v19 }
  0xd8   : > { %970 = vset.pattern.permute.xlu0 %v1149_v14 }
  0xd9   : > { %635 = vperm.xlu0 %970, %v1371_v6  }
  0xdc   : > { %v1408_v15 = vpop.permute.xlu2 %356 }
  0xde   : > { %557 = vperm.xlu2 %964, %v1376_v7  }
  0xdf   : > { %553 = vperm.xlu1 %963, %v1367_v4  }
  0xe1   : > { %655 = vperm.xlu0 %970, %v1376_v7  }
  0xe5   : > { %v391_v17 = vpop.permute.xlu2 %390 }
  0xe6   : > { %968 = vset.pattern.permute.xlu2 %v1148_v12  ;;  %v414_v34 = vmul.f32 %v391_v17, %v379_v28  ;;  %v476_v28 = vld [vmem:[%s1344_s11 + $0x18] sm:$0xff] }
  0xe7   : > { %967 = vset.pattern.permute.xlu1 %v1148_v12  ;;  %590 = vperm.xlu2 %968, %v1360_v2  }
  0xe8   : > { %586 = vperm.xlu1 %967, %v1371_v6  }
  0xe9   : > { %974 = vset.pattern.permute.xlu0 %v1150_v20 }
  0xea   : > { %688 = vperm.xlu0 %974, %v1360_v2  }
  0xec   : > { %v342_v23 = vpop.permute.xlu1 %341 }
  0xed   : > { %v332_v24 = vpop.permute.xlu0 %331  ;;  %v403_v25 = vpop.permute.xlu2 %402  ;;  %v366_v56 = vmul.f32 %v342_v23, %v324_v51 }
  0xee   : > { %v417_v26 = vmul.f32 %v403_v25, %v382_v21  ;;  %v364_v38 = vmul.f32 %v332_v24, %v322_v35  ;;  %v320_v24 = vld [vmem:[%s1336_s19 + $0x28] sm:$0xff]  ;;  %v383_v25 = vld [vmem:[%s1344_s11 + $0x148] sm:$0xff] }
  0xef   : > { %598 = vperm.xlu2 %968, %v1358_v1   ;;  %v373_v8 = vadd.f32 %v366_v56, %v317_v58 }
  0xf0   : > { %v424_v27 = vadd.f32 %v417_v26, %v375_v22  ;;  %594 = vperm.xlu1 %967, %v1369_v5   ;;  %v371_v44 = vadd.f32 %v364_v38, %v315_v39  ;;  %v369_v22 = vmul.f32 %v1408_v15, %v327_v16  ;;  %v427_v26 = vld [vmem:[%s1344_s11 + $0x10] sm:$0xff] }
  0xf1   : > { %v432_v38 = vld [vmem:[%s1344_s11 + $0x150] sm:$0xff] }
  0xf4   : > { %v347_v30 = vpop.permute.xlu1 %346 }
  0xf5   : > { %v337_v32 = vpop.permute.xlu0 %336  ;;  %v411_v33 = vpop.permute.xlu2 %410  ;;  %v367_v60 = vmul.f32 %v347_v30, %v325_v53  ;;  %v376_v30 = vadd.f32 %v369_v22, %v320_v24  ;;  %v477_v22 = vld [vmem:[%s1344_s11 + $0x58] sm:$0xff]  ;;  %v526_v24 = vld [vmem:[%s1344_s11 + $0x60] sm:$0xff] }
  0xf6   : > { %v365_v36 = vmul.f32 %v337_v32, %v323_v29  ;;  %v419_v47 = vmul.f32 %v411_v33, %v384_v41 }
  0xf7   : > { %969 = vset.pattern.permute.xlu2 %v1149_v14  ;;  %v374_v11 = vadd.f32 %v367_v60, %v318_v59 }
  0xf8   : > { %v372_v37 = vadd.f32 %v365_v36, %v316_v31  ;;  %606 = vperm.xlu1 %967, %v1376_v7   ;;  %631 = vperm.xlu2 %969, %v1362_v3  }
  0xfa   : > { %v1429_v40 = vadd.f32 %v414_v34, %v372_v37  ;;  %v428_v37 = vld [vmem:[%s1344_s11 + $0x50] sm:$0xff] }
  0xfd   : > { %v362_v46 = vpop.permute.xlu0 %361 }
  0xfe   : > { %v370_v48 = vmul.f32 %v362_v46, %v328_v42  ;;  %v387_v49 = vpop.permute.xlu1 %386  ;;  %v444_v50 = vpop.permute.xlu2 %443  ;;  %v430_v46 = vld [vmem:[%s1344_s11 + $0xd0] sm:$0xff] }
  0xff   : > { %v413_v52 = vmul.f32 %v387_v49, %v378_v43  ;;  %v464_v12 = vmul.f32 %v444_v50, %v429_v61  ;;  %v529_v61 = vld [vmem:[%s1344_s11 + $0x120] sm:$0xff] }
 0x100   : > { %v377_v54 = vadd.f32 %v370_v48, %v321_v45  ;;  %971 = vset.pattern.permute.xlu1 %v1149_v14  ;;  %643 = vperm.xlu2 %969, %v1369_v5   ;;  %v479_v45 = vld [vmem:[%s1344_s11 + $0xd8] sm:$0xff] }
 0x101   : > { %v420_v55 = vadd.f32 %v413_v52, %v371_v44  ;;  %639 = vperm.xlu1 %971, %v1360_v2  }
 0x102   : > { %v1439_v57 = vadd.f32 %v419_v47, %v377_v54 }
 0x106   : > { %v399_v9 = vpop.permute.xlu1 %398  ;;  %v395_v10 = vpop.permute.xlu0 %394 }
 0x107   : > { %v416_v2 = vmul.f32 %v399_v9, %v381_v62  ;;  %v415_v13 = vmul.f32 %v395_v10, %v380_v63  ;;  %v452_v14 = vpop.permute.xlu2 %451  ;;  %v480_v62 = vld [vmem:[%s1344_s11 + $0x118] sm:$0xff] }
 0x108   : > { %v466_v17 = vmul.f32 %v452_v14, %v431_v0  ;;  %651 = vperm.xlu2 %969, %v1367_v4  }
 0x109   : > { %v423_v18 = vadd.f32 %v416_v2, %v374_v11  ;;  %v422_v19 = vadd.f32 %v415_v13, %v373_v8  ;;  %647 = vperm.xlu1 %971, %v1358_v1  }
 0x10a   : > { %v473_v21 = vadd.f32 %v466_v17, %v424_v27 }
 0x10b   : > { %v1451_v23 = vadd.f32 %v464_v12, %v422_v19 }
 0x10e   : > { %v407_v29 = vpop.permute.xlu1 %406 }
 0x10f   : > { %v418_v31 = vmul.f32 %v407_v29, %v383_v25  ;;  %v436_v32 = vpop.permute.xlu0 %435  ;;  %v485_v33 = vpop.permute.xlu2 %484 }
 0x110   : > { %v462_v34 = vmul.f32 %v436_v32, %v427_v26  ;;  %v511_v35 = vmul.f32 %v485_v33, %v476_v28  ;;  %973 = vset.pattern.permute.xlu2 %v1150_v20  ;;  %v575_v28 = vld [vmem:[%s1344_s11 + $0x68] sm:$0xff] }
 0x111   : > { %v425_v27 = vadd.f32 %v418_v31, %v376_v30  ;;  %972 = vset.pattern.permute.xlu1 %v1150_v20  ;;  %684 = vperm.xlu2 %973, %v1371_v6  }
 0x112   : > { %v469_v15 = vadd.f32 %v462_v34, %v420_v55  ;;  %680 = vperm.xlu1 %972, %v1362_v3   ;;  %v481_v3 = vld [vmem:[%s1344_s11 + $0x158] sm:$0xff]  ;;  %v624_v34 = vld [vmem:[%s1344_s11 + $0x70] sm:$0xff] }
 0x114   : > { %v1461_v36 = vadd.f32 %v511_v35, %v469_v15 }
 0x117   : > { %v440_v39 = vpop.permute.xlu1 %439  ;;  %v456_v41 = vpop.permute.xlu0 %455 }
 0x118   : > { %v463_v42 = vmul.f32 %v440_v39, %v428_v37  ;;  %v467_v43 = vmul.f32 %v456_v41, %v432_v38  ;;  %v497_v44 = vpop.permute.xlu2 %496  ;;  %v673_v39 = vld [vmem:[%s1344_s11 + $0x78] sm:$0xff] }
 0x119   : > { %696 = vperm.xlu2 %973, %v1358_v1   ;;  %v514_v48 = vmul.f32 %v497_v44, %v479_v45 }
 0x11a   : > { %v470_v20 = vadd.f32 %v463_v42, %v1429_v40  ;;  %v474_v6 = vadd.f32 %v467_v43, %v425_v27  ;;  %692 = vperm.xlu1 %972, %v1369_v5   ;;  %v433_v5 = vld [vmem:[%s1344_s11 + $0x190] sm:$0xff]  ;;  %v478_v27 = vld [vmem:[%s1344_s11 + $0x98] sm:$0xff]  ;;  %v527_v43 = vld [vmem:[%s1344_s11 + $0xa0] sm:$0xff] }
 0x11f   : > { %v448_v47 = vpop.permute.xlu1 %447 }
 0x120   : > { %v465_v49 = vmul.f32 %v448_v47, %v430_v46  ;;  %v505_v50 = vpop.permute.xlu2 %504  ;;  %v489_v60 = vpop.permute.xlu0 %488  ;;  %v576_v46 = vld [vmem:[%s1344_s11 + $0xa8] sm:$0xff] }
 0x121   : > { %v516_v51 = vmul.f32 %v505_v50, %v481_v3  ;;  %704 = vperm.xlu2 %973, %v1376_v7   ;;  %v512_v26 = vmul.f32 %v489_v60, %v477_v22  ;;  %v531_v50 = vld [vmem:[%s1344_s11 + $0x1a0] sm:$0xff] }
 0x122   : > { %v472_v52 = vadd.f32 %v465_v49, %v423_v18  ;;  %700 = vperm.xlu1 %972, %v1367_v4  }
 0x123   : > { %v1473_v1 = vadd.f32 %v516_v51, %v474_v6  ;;  %v519_v32 = vadd.f32 %v512_v26, %v470_v20  ;;  %v482_v6 = vld [vmem:[%s1344_s11 + $0x198] sm:$0xff] }
 0x124   : > { %v1475_v40 = vadd.f32 %v514_v48, %v472_v52  ;;  %v580_v52 = vld [vmem:[%s1344_s11 + $0x1a8] sm:$0xff]  ;;  %v678_v26 = vld [vmem:[%s1344_s11 + $0x1b8] sm:$0xff] }
 0x127   : > { %v460_v53 = vpop.permute.xlu1 %459 }
 0x128   : > { %v468_v54 = vmul.f32 %v460_v53, %v433_v5  ;;  %v538_v55 = vpop.permute.xlu2 %537  ;;  %v509_v8 = vpop.permute.xlu0 %508  ;;  %v625_v5 = vld [vmem:[%s1344_s11 + $0xb0] sm:$0xff]  ;;  %v674_v53 = vld [vmem:[%s1344_s11 + $0xb8] sm:$0xff] }
 0x129   : > { %v561_v29 = vmul.f32 %v538_v55, %v526_v24  ;;  %v517_v49 = vmul.f32 %v509_v8, %v482_v6  ;;  %v629_v8 = vld [vmem:[%s1344_s11 + $0x1b0] sm:$0xff]  ;;  %v676_v24 = vld [vmem:[%s1344_s11 + $0x138] sm:$0xff] }
 0x12a   : > { %v1479_v56 = vadd.f32 %v468_v54, %v1439_v57  ;;  %v672_v6 = vld [vmem:[%s1344_s11 + $0x38] sm:$0xff] }
 0x12b   : > { %v568_v35 = vadd.f32 %v561_v29, %v519_v32 }
 0x130   : > { %v493_v58 = vpop.permute.xlu1 %492  ;;  %v550_v59 = vpop.permute.xlu2 %549 }
 0x131   : > { %v564_v0 = vmul.f32 %v550_v59, %v529_v61  ;;  %v542_v12 = vpop.permute.xlu0 %541  ;;  %v513_v41 = vmul.f32 %v493_v58, %v478_v27 }
 0x132   : > { %v562_v47 = vmul.f32 %v542_v12, %v527_v43 }
 0x133   : > { %v520_v3 = vadd.f32 %v513_v41, %v1451_v23  ;;  %v524_v23 = vadd.f32 %v517_v49, %v1479_v56 }
 0x135   : > { %v569_v55 = vadd.f32 %v562_v47, %v520_v3  ;;  %v626_v47 = vld [vmem:[%s1344_s11 + $0xf0] sm:$0xff] }
 0x138   : > { %v501_v7 = vpop.permute.xlu1 %500  ;;  %v558_v63 = vpop.permute.xlu2 %557 }
 0x139   : > { %v515_v4 = vmul.f32 %v501_v7, %v480_v62  ;;  %v566_v58 = vmul.f32 %v558_v63, %v531_v50  ;;  %v578_v62 = vld [vmem:[%s1344_s11 + $0x128] sm:$0xff] }
 0x13a   : > { %v1489_v14 = vpop.permute.xlu0 %582 }
 0x13b   : > { %v522_v9 = vadd.f32 %v515_v4, %v473_v21 }
 0x13d   : > { %v1483_v10 = vadd.f32 %v564_v0, %v522_v9  ;;  %v573_v9 = vadd.f32 %v566_v58, %v524_v23 }
 0x141   : > { %v1485_v11 = vpop.permute.xlu1 %533  ;;  %v591_v57 = vpop.permute.xlu2 %590 }
 0x142   : > { %v1495_v18 = vpop.permute.xlu0 %602  ;;  %v611_v51 = vmul.f32 %v591_v57, %v576_v46 }
 0x144   : > { %v618_v61 = vadd.f32 %v611_v51, %v569_v55  ;;  %v628_v55 = vld [vmem:[%s1344_s11 + $0x170] sm:$0xff] }
 0x149   : > { %v1487_v2 = vpop.permute.xlu1 %545  ;;  %v599_v13 = vpop.permute.xlu2 %598 }
 0x14a   : > { %v613_v12 = vmul.f32 %v599_v13, %v578_v62  ;;  %v574_v13 = vld [vmem:[%s1344_s11 + $0x28] sm:$0xff] }
 0x14b   : > { %v636_v25 = vpop.permute.xlu0 %635 }
 0x14c   : > { %v659_v38 = vmul.f32 %v636_v25, %v624_v34  ;;  %v627_v25 = vld [vmem:[%s1344_s11 + $0x130] sm:$0xff]  ;;  %v620_v29 = vadd.f32 %v613_v12, %v1483_v10 }
 0x151   : > { %v1491_v16 = vpop.permute.xlu1 %553 }
 0x152   : > { %v1493_v17 = vpop.permute.xlu2 %631 }
 0x153   : > { %v656_v15 = vpop.permute.xlu0 %655 }
 0x154   : > { %v664_v56 = vmul.f32 %v656_v15, %v629_v8 }
 0x15a   : > { %v587_v19 = vpop.permute.xlu1 %586  ;;  %v1497_v21 = vpop.permute.xlu2 %643 }
 0x15b   : > { %v610_v33 = vmul.f32 %v587_v19, %v575_v28  ;;  %v525_v19 = vld [vmem:[%s1344_s11 + $0x20] sm:$0xff]  ;;  %v661_v50 = vmul.f32 %v1497_v21, %v626_v47  ;;  %v677_v21 = vld [vmem:[%s1344_s11 + $0x178] sm:$0xff] }
 0x15c   : > { %v689_v54 = vpop.permute.xlu0 %688  ;;  %v560_v28 = vmul.f32 %v1485_v11, %v525_v19  ;;  %v609_v11 = vmul.f32 %v1489_v14, %v574_v13 }
 0x15d   : > { %v617_v37 = vadd.f32 %v610_v33, %v568_v35  ;;  %v709_v4 = vmul.f32 %v689_v54, %v674_v53 }
 0x15e   : > { %v567_v41 = vadd.f32 %v560_v28, %v1461_v36 }
 0x15f   : > { %v666_v20 = vadd.f32 %v659_v38, %v617_v37  ;;  %v623_v37 = vld [vmem:[%s1344_s11 + $0x30] sm:$0xff] }
 0x160   : > { %v658_v43 = vmul.f32 %v1493_v17, %v623_v37  ;;  %v530_v17 = vld [vmem:[%s1344_s11 + $0x160] sm:$0xff] }
 0x162   : > { %v1502_v30 = vpop.permute.xlu1 %594  ;;  %v1504_v31 = vpop.permute.xlu2 %651 }
 0x16a   : > { %v607_v42 = vpop.permute.xlu1 %606 }
 0x16b   : > { %v685_v44 = vpop.permute.xlu2 %684  ;;  %v615_v7 = vmul.f32 %v607_v42, %v580_v52  ;;  %v528_v42 = vld [vmem:[%s1344_s11 + $0xe0] sm:$0xff]  ;;  %v675_v52 = vld [vmem:[%s1344_s11 + $0xf8] sm:$0xff] }
 0x16c   : > { %v708_v45 = vmul.f32 %v685_v44, %v673_v39  ;;  %v577_v44 = vld [vmem:[%s1344_s11 + $0xe8] sm:$0xff] }
 0x16d   : > { %v622_v63 = vadd.f32 %v615_v7, %v573_v9  ;;  %v612_v36 = vmul.f32 %v1502_v30, %v577_v44 }
 0x16e   : > { %v715_v48 = vadd.f32 %v708_v45, %v666_v20  ;;  %v616_v20 = vadd.f32 %v609_v11, %v567_v41  ;;  %v563_v45 = vmul.f32 %v1487_v2, %v528_v42  ;;  %v565_v2 = vmul.f32 %v1491_v16, %v530_v17 }
 0x16f   : > { %v671_v34 = vadd.f32 %v664_v56, %v622_v63 }
 0x170   : > { %722 = vst [vmem:[%s1516_s23 + $0x8] sm:$0xff] %v715_v48  ;;  %v665_v3 = vadd.f32 %v658_v43, %v616_v20  ;;  %v570_v48 = vadd.f32 %v563_v45, %v1475_v40  ;;  %v572_v40 = vadd.f32 %v565_v2, %v1473_v1 }
 0x172   : > { %v619_v51 = vadd.f32 %v612_v36, %v570_v48 }
 0x173   : > { %v640_v59 = vpop.permute.xlu1 %639  ;;  %v697_v60 = vpop.permute.xlu2 %696 }
 0x174   : > { %v660_v0 = vmul.f32 %v640_v59, %v625_v5  ;;  %v711_v35 = vmul.f32 %v697_v60, %v676_v24  ;;  %v579_v5 = vld [vmem:[%s1344_s11 + $0x168] sm:$0xff]  ;;  %v668_v30 = vadd.f32 %v661_v50, %v619_v51  ;;  %v663_v59 = vmul.f32 %v1504_v31, %v628_v55 }
 0x175   : > { %v614_v58 = vmul.f32 %v1495_v18, %v579_v5 }
 0x176   : > { %v667_v57 = vadd.f32 %v660_v0, %v618_v61 }
 0x177   : > { %v621_v60 = vadd.f32 %v614_v58, %v572_v40 }
 0x178   : > { %v716_v22 = vadd.f32 %v709_v4, %v667_v57 }
 0x179   : > { %v670_v62 = vadd.f32 %v663_v59, %v621_v60 }
 0x17a   : > { %723 = vst [vmem:[%s1516_s23 + $0x10] sm:$0xff] %v716_v22 }
 0x17b   : > { %v648_v32 = vpop.permute.xlu1 %647  ;;  %v705_v33 = vpop.permute.xlu2 %704 }
 0x17c   : > { %v662_v27 = vmul.f32 %v648_v32, %v627_v25  ;;  %v713_v15 = vmul.f32 %v705_v33, %v678_v26 }
 0x17e   : > { %v669_v38 = vadd.f32 %v662_v27, %v620_v29  ;;  %v720_v39 = vadd.f32 %v713_v15, %v671_v34 }
 0x180   : > { %v718_v10 = vadd.f32 %v711_v35, %v669_v38  ;;  %727 = vst [vmem:[%s1516_s23 + $0x30] sm:$0xff] %v720_v39 }
 0x182   : > { %725 = vst [vmem:[%s1516_s23 + $0x20] sm:$0xff] %v718_v10 }
 0x184   : > { %v681_v46 = vpop.permute.xlu1 %680 }
 0x185   : > { %v707_v14 = vmul.f32 %v681_v46, %v672_v6 }
 0x187   : > { %v714_v49 = vadd.f32 %v707_v14, %v665_v3 }
 0x189   : > { %721 = vst [vmem:[%s1516_s23] sm:$0xff] %v714_v49 }
 0x18c   : > { %v693_v53 = vpop.permute.xlu1 %692 }
 0x18d   : > { %v710_v54 = vmul.f32 %v693_v53, %v675_v52 }
 0x18f   : > { %v717_v23 = vadd.f32 %v710_v54, %v668_v30 }
 0x191   : > { %724 = vst [vmem:[%s1516_s23 + $0x18] sm:$0xff] %v717_v23 }
 0x194   : > { %v701_v61 = vpop.permute.xlu1 %700 }
 0x195   : > { %v712_v16 = vmul.f32 %v701_v61, %v677_v21  ;;  %735 = sbr.rel (!%p1222_p9) target bundleno = 441 (0x1b9), region = 44 }
 0x197   : > { %v719_v7 = vadd.f32 %v712_v16, %v670_v62 }
 0x199   : > { %726 = vst [vmem:[%s1516_s23 + $0x28] sm:$0xff] %v719_v7 }
 0x19a   : > { %s1645_s20 = smov (!%p738_p6, %s737_s20), 7 }
 0x19b   : > { %s877_s28 = sshll.u32 %s1645_s20, 3 }
 0x19c   : > { %s741_s9 = ssub.s32 56, %s877_s28 }
 0x19d   : > { %s742_s4 = sshll.u32 %s741_s9, 4 }
 0x19e   : > { %743 = vsyncadd %s729_s30, %s742_s4  ;;  %p1568_p4 = scmp.ne.s32.totalorder %s877_s28, 0  ;;  %s889_s24 = smul.u32 56, %s1195_s16 }
 0x19f   : > { %s748_s19 = sshll.u32 %s1516_s23, 4  ;;  %s881_s5 = sshll.u32 %s1645_s20, 7  ;;  %s1578_s19 = int_to_ptr.vmem [resolvable:$true] %s748_s19 }
 0x1a0   : > { %s746_s7 = scalar_lea.hbm %s1625_s3, %s889_s24  ;;  %s1053_s29 = sshra.s32 %s1578_s19, 4  ;;  %s1054_s29 = int_to_ptr.vmem [resolvable:$true] %s1053_s29 }
 0x1a1   : > { %s750_s8 = sshll.u32 %s746_s7, 4  ;;  %s1055_s6 = sshrl.u32 %s881_s5, 4  ;;  %s1580_s8 = int_to_ptr.hbm [resolvable:$true] %s750_s8 }
 0x1a2   : > { %s1060_s26 = scalar_lea.vmem %s1054_s29, %s1055_s6  ;;  %s1151_s16 = smov [#allocation7]  }
 0x1a3   : > { %p1061_p9 = scmp.ne.s32.totalorder %s1054_s29, %s1060_s26  ;;  %s1064_s27 = scalar_lea.vmem %s1151_s16, 112 }
 0x1a4   : > { %p1066_p12 = scmp.lt.s32.totalorder %s1064_s27, %s1060_s26 }
 0x1a5   : > { %p1062_p7 = pnand %p1061_p9, %p1568_p4 }
 0x1a7   : > { %p1063_p8 = pneg %p1062_p7 }
 0x1a9   : > { %p1068_p0 = pnand %p1066_p12, %p1063_p8 }
 0x1ab   : > { %1071 = shalt.err (!%p1068_p0)
}
 0x1ac   : > { %s1072_s23 = sshra.s32 %s1580_s8, 4  ;;  %s1083_s24 = scalar_lea.hbm %s1625_s3, 104  ;;  %s1073_s23 = int_to_ptr.hbm [resolvable:$true] %s1072_s23 }
 0x1ad   : > { %s1079_s28 = scalar_lea.hbm %s1073_s23, %s1055_s6  ;;  %p1084_p13 = scmp.lt.s32.totalorder %s1073_s23, %s1625_s3 }
 0x1ae   : > { %p1080_p1 = scmp.ne.s32.totalorder %s1073_s23, %s1079_s28  ;;  %p1085_p2 = scmp.lt.s32.totalorder %s1083_s24, %s1079_s28 }
 0x1b0   : > { %p1081_p10 = pnand %p1080_p1, %p1568_p4  ;;  %p1086_p3 = por %p1085_p2, %p1084_p13 }
 0x1b2   : > { %p1082_p11 = pneg %p1081_p10 }
 0x1b4   : > { %p1087_p5 = pnand %p1086_p3, %p1082_p11 }
 0x1b6   : > { %1090 = shalt.err (!%p1087_p5)
}
 0x1b7   : > { %s1152_s7 = smov 128   ;;  %s1153_s29 = smov 8  }
 0x1b8   : > { %756 = dma.vmem_to_hbm [thread:$0]  (%p1568_p4), %s1578_s19, %s881_s5, %s1580_s8, %s729_s30, %s1152_s7, %s1152_s7, %s1153_s29  }
 0x1b9 PF: > { %s765_s6 = sand.u32 1, %s1122_s12   ;;  %p1634_p6 = scmp.ne.s32.totalorder %s1630_s25, 0 }
 0x1ba   : > { %p1635_p9 = scmp.ge.s32.totalorder %s1134_s15, 2  ;;  %s766_s26 = scalar_lea.sflag [#allocation4], %s765_s6 }
 0x1bc   : > { %p900_p7 = pnand %p1635_p9, %p1634_p6 }
 0x1be   : > { %p901_p8 = pneg %p900_p7 }
 0x1c0   : > { %1117 = dma.done.wait (%p901_p8), %s766_s26, 896  }
 0x1c1   : > { %1119 = vsyncadd (%p901_p8), %s766_s26, 4294966400  ;;  %p19_p12 = scmp.ge.s32.totalorder %s1199_s18, 4   ;;  %s1636_s12 = smov %s1126_s13 }
 0x1c2   : > { %s1637_s13 = smov %s1130_s14  ;;  %s1638_s14 = smov %s1211_s21 }
 0x1c3   : > { %s1639_s15 = smov %s1199_s18  ;;  %21 = sbr.rel (!%p19_p12) target bundleno = 7 (0x7), region = 93 }
 0x1c8   :  { %772 = vsyncpa [#allocation3], 1 }
 0x1c9   :  { %774 = vsyncpa [#allocation3 + $0x1], 1 }
 0x1ca   :  { %775 = vsyncpa [#allocation6], 1 }
 0x1cb   :  { %777 = vsyncpa [#allocation6 + $0x1], 1 }
 0x1cc   :  { %778 = vsyncpa [#allocation4], 1 }
 0x1cd   :  { %780 = vsyncpa [#allocation4 + $0x1], 1 }

</bundles_post_ra>
